<compile_context>
chip_gen: v5e
topology: v5e:2x2
jax: 0.10.0
libtpu: 0.0.40
codegen_flags: <defaults>
</compile_context>

<pallas_src>
import functools

import jax
import jax.numpy as jnp
from jax import lax
from jax.experimental import pallas as pl
from jax.experimental.pallas import tpu as pltpu


# Portable VMEM budgeting: fits v7x (64 MiB physical / TC) with headroom and is
# comfortably inside v5e/v6e's 128 MiB.
_VMEM_LIMIT_BYTES = 48 * 1024 * 1024        # scoped VMEM limit we request
_TILE_FOOTPRINT_BUDGET = 28 * 1024 * 1024   # inputs (double-buffered) + temps


def _pick_tile(B, D, x_itemsize, y_itemsize):
    """Largest lane-dense D tile (multiple of 128) fitting the VMEM budget."""
    # Per-column VMEM bytes for one grid step:
    #   x, y input tiles, double-buffered ............ 2 * B * (isz_x + isz_y)
    #   in-vreg f32 upcasts of x, y (worst case) ..... 2 * B * 4
    #   z = concat([x, y]) in f32 .................... 2 * B * 4
    per_col = 2 * B * (x_itemsize + y_itemsize) + 4 * B * 4
    td = max(128, (_TILE_FOOTPRINT_BUDGET // per_col) // 128 * 128)
    d_padded = pl.cdiv(D, 128) * 128
    return min(td, d_padded)


def _gram_kernel(x_ref, y_ref, g_ref, *, B, D, td, tiles_per_shard, needs_mask):
    c = pl.program_id(0)   # shard (TensorCore) index — "parallel"
    t = pl.program_id(1)   # D-tile index within the shard — "arbitrary" (reduction)

    @pl.when(t == 0)
    def _():
        g_ref[...] = jnp.zeros_like(g_ref)

    # In-vreg upcast only; HBM traffic stays in the native activation dtype.
    x = x_ref[...].astype(jnp.float32)   # (B, td)
    y = y_ref[...].astype(jnp.float32)   # (B, td)

    if needs_mask:
        # Ragged tail / phantom shard tile: zero the invalid columns so they
        # contribute exactly 0 to every accumulator entry.
        tile = c * tiles_per_shard + t
        valid = D - tile * td            # <= 0 for phantom tiles, > td for full ones
        col = lax.broadcasted_iota(jnp.int32, (B, td), 1)
        keep = col < valid
        x = jnp.where(keep, x, 0.0)
        y = jnp.where(keep, y, 0.0)

    z = jnp.concatenate([x, y], axis=0)          # (2B, td)
    dims = (((1,), (1,)), ((), ()))              # contract the feature axis (Z Z^T)
    g_ref[...] += lax.dot_general(
        z, z, dims, preferred_element_type=jnp.float32)[None]


def _fused_gram(x, y):
    """x, y: (B, D). Returns G = [x;y] [x;y]^T  (2B x 2B, f32) in one HBM pass."""
    B, D = x.shape
    td = _pick_tile(B, D, x.dtype.itemsize, y.dtype.itemsize)
    n_tiles = pl.cdiv(D, td)

    # v7x: shard the D range across both TensorCores; sequential (harmless) on
    # single-core v5e/v6e.  Only enabled when there are enough tiles for both
    # cores' DMA pipelines to stay busy.
    num_shards = 2 if n_tiles >= 4 else 1
    tiles_per_shard = pl.cdiv(n_tiles, num_shards)
    phantom = num_shards * tiles_per_shard != n_tiles
    needs_mask = (D % td != 0) or phantom

    def in_index_map(c, t):
        tile = c * tiles_per_shard + t
        if phantom:
            # Clamp the phantom tile onto a valid block; it is masked to zero
            # inside the kernel so it contributes nothing.
            tile = jnp.minimum(tile, n_tiles - 1)
        return (0, tile)

    ZB = 2 * B
    kernel = functools.partial(
        _gram_kernel, B=B, D=D, td=td,
        tiles_per_shard=tiles_per_shard, needs_mask=needs_mask)

    partials = pl.pallas_call(
        kernel,
        grid=(num_shards, tiles_per_shard),
        in_specs=[pl.BlockSpec((B, td), in_index_map),
                  pl.BlockSpec((B, td), in_index_map)],
        out_specs=pl.BlockSpec((1, ZB, ZB), lambda c, t: (c, 0, 0)),
        out_shape=jax.ShapeDtypeStruct((num_shards, ZB, ZB), jnp.float32),
        compiler_params=pltpu.CompilerParams(
            dimension_semantics=("parallel", "arbitrary"),
            vmem_limit_bytes=_VMEM_LIMIT_BYTES),
    )(x, y)

    return jnp.sum(partials, axis=0)             # (2B, 2B)


def diff_loss(input1, input2, alpha=1.0, beta=0.1):
    B = input1.shape[0]
    x = input1.reshape(B, -1)                    # no dtype cast: stream native dtype
    y = input2.reshape(B, -1)
    D1, D2 = x.shape[1], y.shape[1]
    if D1 != D2:
        # Same constraint as torch.mm(x_norm, y_norm.t()) in the reference.
        raise ValueError(f"flattened feature dims must match, got {D1} vs {D2}")

    # ---- one fused Pallas pass over D --------------------------------------
    G = _fused_gram(x, y)
    sx, sy, sxy = G[:B, :B], G[B:, B:], G[:B, B:]
    sxx = jnp.diagonal(sx)                       # row norms^2 of x
    syy = jnp.diagonal(sy)                       # row norms^2 of y

    # ---- adaptive covariance / orthogonality loss (O(B^3) epilogue) --------
    # Centering over the batch commutes with the Gram: (Hx)(Hx)^T = H (x x^T) H.
    h = jnp.eye(B, dtype=jnp.float32) - 1.0 / B
    gx = h @ sx @ h
    gy = h @ sy @ h
    # TODO(synk): torch.svd on the (B, D) centered matrices has no Pallas TPU
    # equivalent; the left singular vectors are recovered from the B x B
    # centered Grams via eigh (the loss only depends on the spanned subspace,
    # so this is equivalent up to sign/basis ambiguity the loss is invariant to).
    _, ux = jnp.linalg.eigh(gx)                  # ascending eigenvalues
    _, uy = jnp.linalg.eigh(gy)
    ux = ux[:, ::-1]                             # descending (torch.svd order)
    uy = uy[:, ::-1]
    k = min(B, D1, D2)                           # torch.svd U cols, then [:, :min_dim]
    cov = (ux[:, :k].T @ uy[:, :k]) / (B - 1)
    orthogonal_loss = jnp.sum(cov * cov) / cov.shape[0]

    # ---- feature similarity loss (finalized from the Pallas Gram) ----------
    eps = 1e-12                                  # F.normalize default eps
    inv_x = 1.0 / jnp.maximum(jnp.sqrt(sxx), eps)
    inv_y = 1.0 / jnp.maximum(jnp.sqrt(syy), eps)
    sim = sxy * inv_x[:, None] * inv_y[None, :]  # (B, B), tiny
    diag = jnp.diagonal(sim)
    pos_sim = jnp.mean(diag)
    neg_sim = (jnp.sum(sim) - jnp.sum(diag)) / (B * B - B)
    diff = neg_sim - pos_sim

    dim_ratio = min(D1, D2) / max(D1, D2)
    adaptive_alpha = alpha * dim_ratio
    return adaptive_alpha * orthogonal_loss + beta * diff


if __name__ == "__main__":
    key = jax.random.PRNGKey(0)
    k1, k2 = jax.random.split(key)
    # NCHW inputs, flattened inside forward: B=2, C=4, H=W=16 -> D=1024.
    input1 = jax.random.normal(k1, (2, 4, 16, 16), dtype=jnp.float32)
    input2 = jax.random.normal(k2, (2, 4, 16, 16), dtype=jnp.float32)

    loss = jax.jit(diff_loss)(input1, input2)
    jax.block_until_ready(loss)
    assert loss.shape == () and bool(jnp.isfinite(loss))
    print("KERNEL_OK")
</pallas_src>

<mosaic_0001>
module attributes {stable_mosaic.version = 11 : i64} {
  func.func @_gram_kernel(%arg0: i32, %arg1: i32, %arg2: memref<2x1024xf32, #tpu.memory_space<vmem>>, %arg3: memref<2x1024xf32, #tpu.memory_space<vmem>>, %arg4: memref<1x4x4xf32, #tpu.memory_space<vmem>>) attributes {dimension_semantics = [#tpu.dimension_semantics<parallel>, #tpu.dimension_semantics<arbitrary>], iteration_bounds = array<i64: 1, 1>, scalar_prefetch = 0 : i64, scratch_operands = 0 : i64, tpu.core_type = #tpu.core_type<tc>, window_params = [{transform_indices = @transform_0, window_bounds = array<i64: 2, 1024>}, {transform_indices = @transform_1, window_bounds = array<i64: 2, 1024>}, {transform_indices = @transform_2, window_bounds = array<i64: 1, 4, 4>}]} {
    %c0_i32 = arith.constant 0 : i32
    %0 = arith.cmpi eq, %arg1, %c0_i32 : i32
    %1 = arith.extui %0 : i1 to i32
    %c0_i32_0 = arith.constant 0 : i32
    %2 = arith.cmpi ne, %1, %c0_i32_0 : i32
    scf.if %2 {
      %cst_10 = arith.constant 0.000000e+00 : f32
      %11 = vector.broadcast %cst_10 : f32 to vector<1x4x4xf32>
      %c0_11 = arith.constant 0 : index
      %c0_12 = arith.constant 0 : index
      %c0_13 = arith.constant 0 : index
      %12 = vector.load %arg4[%c0_11, %c0_12, %c0_13] : memref<1x4x4xf32, #tpu.memory_space<vmem>>, vector<1x4x4xf32>
      tpu.vector_store %arg4[%c0_11, %c0_12, %c0_13], %11 {strides = array<i32>} : memref<1x4x4xf32, #tpu.memory_space<vmem>>, vector<1x4x4xf32>,
    } else {
    }
    %c0 = arith.constant 0 : index
    %c0_1 = arith.constant 0 : index
    %3 = vector.load %arg2[%c0, %c0_1] : memref<2x1024xf32, #tpu.memory_space<vmem>>, vector<2x1024xf32>
    %c0_2 = arith.constant 0 : index
    %c0_3 = arith.constant 0 : index
    %4 = vector.load %arg3[%c0_2, %c0_3] : memref<2x1024xf32, #tpu.memory_space<vmem>>, vector<2x1024xf32>
    %5 = tpu.concatenate %3, %4 in 0 : vector<2x1024xf32>, vector<2x1024xf32> -> vector<4x1024xf32>
    %c0_4 = arith.constant 0 : index
    %c0_5 = arith.constant 0 : index
    %c0_6 = arith.constant 0 : index
    %6 = vector.load %arg4[%c0_4, %c0_5, %c0_6] : memref<1x4x4xf32, #tpu.memory_space<vmem>>, vector<1x4x4xf32>
    %cst = arith.constant dense<0.000000e+00> : vector<4x4xf32>
    %7 = tpu.matmul %5, %5, %cst {dimension_numbers = #tpu.dot_dimension_numbers<[1], [1], [0], [0], [0, 0, 1, 0], [], []>} : vector<4x1024xf32>, vector<4x1024xf32>, vector<4x4xf32> -> vector<4x4xf32>
    %8 = vector.shape_cast %7 : vector<4x4xf32> to vector<1x4x4xf32>
    %9 = arith.addf %6, %8 : vector<1x4x4xf32>
    %c0_7 = arith.constant 0 : index
    %c0_8 = arith.constant 0 : index
    %c0_9 = arith.constant 0 : index
    %10 = vector.load %arg4[%c0_7, %c0_8, %c0_9] : memref<1x4x4xf32, #tpu.memory_space<vmem>>, vector<1x4x4xf32>
    tpu.vector_store %arg4[%c0_7, %c0_8, %c0_9], %9 {strides = array<i32>} : memref<1x4x4xf32, #tpu.memory_space<vmem>>, vector<1x4x4xf32>,
    return
  }
  func.func @transform_0(%arg0: i32, %arg1: i32) -> (i32, i32) {
    %c1_i32 = arith.constant 1 : i32
    %0 = arith.muli %arg0, %c1_i32 : i32
    %1 = arith.addi %0, %arg1 : i32
    %c0_i32 = arith.constant 0 : i32
    %c0_i32_0 = arith.constant 0 : i32
    return %c0_i32, %1 : i32, i32
  }
  func.func @transform_1(%arg0: i32, %arg1: i32) -> (i32, i32) {
    %c1_i32 = arith.constant 1 : i32
    %0 = arith.muli %arg0, %c1_i32 : i32
    %1 = arith.addi %0, %arg1 : i32
    %c0_i32 = arith.constant 0 : i32
    %c0_i32_0 = arith.constant 0 : i32
    return %c0_i32, %1 : i32, i32
  }
  func.func @transform_2(%arg0: i32, %arg1: i32) -> (i32, i32, i32) {
    %c0_i32 = arith.constant 0 : i32
    %c0_i32_0 = arith.constant 0 : i32
    %c0_i32_1 = arith.constant 0 : i32
    return %arg0, %c0_i32, %c0_i32_0 : i32, i32, i32
  }
}

</mosaic_0001>

<bundles_post_ra>
// kernel: diff_loss.1
= control target key start
LH: loop header
LB: loop body
LE: loop exit
PB: predicated region body
PF: predicated region fallthrough
CT: control target
= control target key end

     0   :  { %vm108_vm0 = vcmask 1041408   ;;  %vm59_vm1 = vcmask 27648   ;;  %v298_v28 = vmov 0.0   ;;  %s345_s0 = inlined_call_operand.vmem [shape: f32[2,1024], index: 0, kind: input, shape index: {}]   ;;  %s346_s1 = inlined_call_operand.vmem [shape: f32[2,1024], index: 1, kind: input, shape index: {}]   ;;  %s347_s2 = inlined_call_operand.vmem [shape: f32[1,4,4], index: 2, kind: output, shape index: {}]  }
   0x1   :  { %v61_v0 = vld [vmem:[%s345_s0] sm:$0xff]  ;;  %v62_v1 = vld [vmem:[%s345_s0 + $0x8] sm:$0xff]  ;;  %60 = vst.msk [vmem:[%s347_s2] sm:$0xf] %vm59_vm1, %v298_v28 }
   0x2   :  { %67 = vst [vmem:[#allocation1] ss:$4 sm:$0xff] %v61_v0  ;;  %v63_v2 = vld [vmem:[%s346_s1] sm:$0xff]  ;;  %v64_v7 = vld [vmem:[%s346_s1 + $0x8] sm:$0xff] }
   0x3   :  { %69 = vst [vmem:[#allocation1 + $0x20] ss:$4 sm:$0xff] %v62_v1 }
   0x8   :  { %v117_v42 = vld [vmem:[%s347_s2] sm:$0xf] }
   0x9   :  { %v70_v3 = vld.sshfl [vmem:[#allocation1] sm:$0xff pattern:$0x73625140]  ;;  %v71_v4 = vld.sshfl [vmem:[#allocation1 + $0x8] sm:$0xff pattern:$0x73625140] }
   0xa   :  { %v72_v5 = vld.sshfl [vmem:[#allocation1 + $0x10] sm:$0xff pattern:$0x73625140]  ;;  %v73_v6 = vld.sshfl [vmem:[#allocation1 + $0x18] sm:$0xff pattern:$0x73625140] }
   0xb   :  { %89 = vst [vmem:[#allocation1 + $0x1] ss:$4 sm:$0xff] %v63_v2  ;;  %v74_v8 = vld.sshfl [vmem:[#allocation1 + $0x20] sm:$0xff pattern:$0x73625140] }
   0xc   :  { %v75_v9 = vld.sshfl [vmem:[#allocation1 + $0x28] sm:$0xff pattern:$0x73625140]  ;;  %v76_v10 = vld.sshfl [vmem:[#allocation1 + $0x30] sm:$0xff pattern:$0x73625140] }
   0xd   :  { %v77_v11 = vld.sshfl [vmem:[#allocation1 + $0x38] sm:$0xff pattern:$0x73625140] }
   0xe   :  { %91 = vst [vmem:[#allocation1 + $0x21] ss:$4 sm:$0xff] %v64_v7 }
  0x12   :  { %v94_v12 = vld.sshfl [vmem:[#allocation1 + $0x10] sm:$0xff pattern:$0x73625140]  ;;  %v92_v13 = vld.sshfl [vmem:[#allocation1] sm:$0xff pattern:$0x73625140] }
  0x13   :  { %v111_v14 = vsel %vm108_vm0, %v72_v5, %v94_v12  ;;  %v109_v15 = vsel %vm108_vm0, %v70_v3, %v92_v13  ;;  %v93_v16 = vld.sshfl [vmem:[#allocation1 + $0x8] sm:$0xff pattern:$0x73625140]  ;;  %v95_v17 = vld.sshfl [vmem:[#allocation1 + $0x18] sm:$0xff pattern:$0x73625140] }
  0x14   :  { %173 = vmatpush.xpose.msra.mxu2 %v111_v14  ;;  %133 = vmatpush.xpose.msra.mxu0 %v109_v15  ;;  %v110_v18 = vsel %vm108_vm0, %v71_v4, %v93_v16  ;;  %v112_v19 = vsel %vm108_vm0, %v73_v6, %v95_v17 }
  0x15   :  { %153 = vmatpush.xpose.msra.mxu1 %v110_v18  ;;  %193 = vmatpush.xpose.msra.mxu3 %v112_v19  ;;  %v98_v20 = vld.sshfl [vmem:[#allocation1 + $0x30] sm:$0xff pattern:$0x73625140]  ;;  %v96_v21 = vld.sshfl [vmem:[#allocation1 + $0x20] sm:$0xff pattern:$0x73625140] }
  0x16   :  { %v115_v22 = vsel %vm108_vm0, %v76_v10, %v98_v20  ;;  %v113_v23 = vsel %vm108_vm0, %v74_v8, %v96_v21  ;;  %v99_v24 = vld.sshfl [vmem:[#allocation1 + $0x38] sm:$0xff pattern:$0x73625140]  ;;  %v97_v25 = vld.sshfl [vmem:[#allocation1 + $0x28] sm:$0xff pattern:$0x73625140] }
  0x17   :  { %174 = vmatmul.f32.vlgmr.msra.gmra.mxu2 %v111_v14  ;;  %134 = vmatmul.f32.vlgmr.msra.gmra.mxu0 %v109_v15  ;;  %v116_v26 = vsel %vm108_vm0, %v77_v11, %v99_v24  ;;  %v114_v27 = vsel %vm108_vm0, %v75_v9, %v97_v25 }
  0x18   :  { %253 = vmatpush.xpose.msrb.mxu2 %v115_v22  ;;  %154 = vmatmul.f32.vlgmr.msra.gmra.mxu1 %v110_v18 }
  0x19   :  { %194 = vmatmul.f32.vlgmr.msra.gmra.mxu3 %v112_v19  ;;  %213 = vmatpush.xpose.msrb.mxu0 %v113_v23 }
  0x1a   :  { %273 = vmatpush.xpose.msrb.mxu3 %v116_v26  ;;  %233 = vmatpush.xpose.msrb.mxu1 %v114_v27 }
  0x1f   :  { %254 = vmatmul.f32.vlgmr.msrb.gmra.mxu2 %v115_v22  ;;  %214 = vmatmul.f32.vlgmr.msrb.gmra.mxu0 %v113_v23 }
  0x20   :  { %234 = vmatmul.f32.vlgmr.msrb.gmra.mxu1 %v114_v27 }
  0x21   :  { %274 = vmatmul.f32.vlgmr.msrb.gmra.mxu3 %v116_v26 }
  0x94   :  { %v135_v29 = vpop.f32.mrf.mxu0 }
  0x95   :  { %v155_v30 = vpop.f32.mrf.mxu1 }
  0x96   :  { %v156_v31 = vadd.f32 %v155_v30, %v135_v29 }
  0x9a   :  { %v175_v32 = vpop.f32.mrf.mxu2 }
  0x9b   :  { %v176_v33 = vadd.f32 %v175_v32, %v156_v31 }
  0x9c   :  { %v195_v34 = vpop.f32.mrf.mxu3  ;;  %v215_v35 = vpop.f32.mrf.mxu0 }
  0x9d   :  { %v196_v36 = vadd.f32 %v195_v34, %v176_v33  ;;  %v235_v37 = vpop.f32.mrf.mxu1 }
  0x9f   :  { %v216_v38 = vadd.f32 %v215_v35, %v196_v36 }
  0xa1   :  { %v236_v39 = vadd.f32 %v235_v37, %v216_v38 }
  0xa2   :  { %v255_v40 = vpop.f32.mrf.mxu2 }
  0xa3   :  { %v256_v41 = vadd.f32 %v255_v40, %v236_v39 }
  0xa4   :  { %v275_v43 = vpop.f32.mrf.mxu3 }
  0xa5   :  { %v276_v44 = vadd.f32 %v275_v43, %v256_v41 }
  0xa7   :  { %v278_v45 = vadd.f32 %v276_v44, %v117_v42 }
  0xa9   :  { %280 = vst.msk [vmem:[%s347_s2] sm:$0xf] %vm59_vm1, %v278_v45 }

</bundles_post_ra>
